<compile_context>
chip_gen: v5e
topology: v5e:2x2
jax: 0.10.0
libtpu: 0.0.40
codegen_flags: <defaults>
</compile_context>

<pallas_src>
import functools
import math

import jax
import jax.numpy as jnp
from jax.experimental import pallas as pl
from jax.experimental.pallas import tpu as pltpu


def _round_up(a, b):
    return ((a + b - 1) // b) * b


def _patch_embed_kernel(x_ref, w_ref, b_ref, g_ref, beta_ref, o_ref, *, eps):
    # x_ref:    (TM, K_pad)   bf16 im2col patch rows (streamed)
    # w_ref:    (K_pad, D)    bf16 flattened conv weight (VMEM resident)
    # b_ref:    (1, D)        f32 conv bias
    # g_ref:    (1, D)        f32 LayerNorm gamma
    # beta_ref: (1, D)        f32 LayerNorm beta
    # o_ref:    (TM, D)       bf16 normalized embeddings
    y = jnp.dot(x_ref[...], w_ref[...],
                preferred_element_type=jnp.float32) + b_ref[...]

    # Single-pass LayerNorm statistics over the true embedding dim D.
    d = y.shape[-1]
    inv_d = 1.0 / float(d)
    s1 = jnp.sum(y, axis=-1, keepdims=True)
    s2 = jnp.sum(y * y, axis=-1, keepdims=True)
    mean = s1 * inv_d
    # Clamp: E[y^2] - mean^2 can round slightly negative (cancellation).
    var = jnp.maximum(s2 * inv_d - mean * mean, 0.0)
    inv_std = jax.lax.rsqrt(var + eps)

    o_ref[...] = ((y - mean) * inv_std * g_ref[...] + beta_ref[...]).astype(o_ref.dtype)


def _im2col_nhwc(x_nchw, kh, kw, stride, pad_h, pad_w, dtype):
    """NCHW -> (B*Ho*Wo, kh*kw*C) patch matrix, K ordered as (kh, kw, C)."""
    B, C, H, W = x_nchw.shape
    x = jnp.transpose(x_nchw, (0, 2, 3, 1)).astype(dtype)        # NHWC, compute dtype
    xp = jnp.pad(x, ((0, 0), (pad_h, pad_h), (pad_w, pad_w), (0, 0)))
    Ho = (H + 2 * pad_h - kh) // stride + 1
    Wo = (W + 2 * pad_w - kw) // stride + 1
    wins = []
    for i in range(kh):
        for j in range(kw):
            wins.append(xp[:, i:i + stride * Ho:stride,
                           j:j + stride * Wo:stride, :])          # (B, Ho, Wo, C)
    patches = jnp.concatenate(wins, axis=-1)                      # (B, Ho, Wo, kh*kw*C)
    return patches.reshape(B * Ho * Wo, kh * kw * C), Ho, Wo


def overlap_patch_embed(x, conv_w, conv_b, ln_w, ln_b, *, stride, eps=1e-5,
                        row_tile=1024, compute_dtype=jnp.bfloat16):
    """Forward of OverlapPatchEmbed. Returns (tokens (B, Ho*Wo, D) bf16, Ho, Wo).

    x:      (B, C, H, W)   NCHW input
    conv_w: (D, C, kh, kw) PyTorch Conv2d weight
    conv_b: (D,)           Conv2d bias
    ln_w:   (D,)           LayerNorm weight
    ln_b:   (D,)           LayerNorm bias
    """
    B = x.shape[0]
    D, C, kh, kw = conv_w.shape
    pad_h, pad_w = kh // 2, kw // 2

    patches, Ho, Wo = _im2col_nhwc(x, kh, kw, stride, pad_h, pad_w, compute_dtype)
    N, K = patches.shape

    # K only rounded to a multiple of 16 (bf16 sublane packing); no 128 over-pad.
    K_pad = _round_up(K, 16)

    # Weight re-ordered to match the (kh, kw, C) K-ordering of the patches.
    w_mat = jnp.transpose(conv_w, (2, 3, 1, 0)).reshape(K, D).astype(compute_dtype)
    w_mat = jnp.pad(w_mat, ((0, K_pad - K), (0, 0)))              # zero K rows: no-op in dot
    b_row = conv_b.astype(jnp.float32).reshape(1, D)
    g_row = ln_w.astype(jnp.float32).reshape(1, D)
    beta_row = ln_b.astype(jnp.float32).reshape(1, D)

    x_item = patches.dtype.itemsize
    o_item = jnp.zeros((), compute_dtype).dtype.itemsize
    w_item = w_mat.dtype.itemsize

    def tile_bytes(tm):
        return (2 * tm * K_pad * x_item       # streamed patch tiles (double buffered)
                + 2 * tm * D * o_item         # output tiles (double buffered)
                + 2 * K_pad * D * w_item      # resident weight (assume 2 buffers)
                + 2 * 3 * 8 * D * 4)          # bias/gamma/beta rows

    # Row tile: as large as possible, but keep >= ~4 grid steps when N allows
    # (v7x megacore sharding of the "parallel" axis) and stay under a
    # conservative cross-generation VMEM budget.
    vmem_budget = 24 * 1024 * 1024
    tm = min(row_tile, max(8, _round_up((N + 3) // 4, 8)))
    while tm > 8 and tile_bytes(tm) > vmem_budget:
        tm = max(8, _round_up(tm // 2, 8))
    N_pad = _round_up(N, tm)

    # Zero padding is correctness-preserving: zero K-cols contribute nothing to
    # the dot; padded rows (LayerNorm of zeros -> finite rsqrt(eps)) are sliced
    # off below and never read.
    patches = jnp.pad(patches, ((0, N_pad - N), (0, K_pad - K)))

    grid = (N_pad // tm,)

    # Honest VMEM budget + fixed headroom, capped below v7x's 64 MiB.
    vmem_limit = int(min(56 * 1024 * 1024, tile_bytes(tm) + 4 * 1024 * 1024))

    flops = 2 * N_pad * K_pad * D + 10 * N_pad * D
    bytes_accessed = (N_pad * K_pad * x_item + K_pad * D * w_item
                      + N_pad * D * o_item + 3 * D * 4)

    kernel = functools.partial(_patch_embed_kernel, eps=eps)

    out = pl.pallas_call(
        kernel,
        out_shape=jax.ShapeDtypeStruct((N_pad, D), compute_dtype),
        grid_spec=pltpu.PrefetchScalarGridSpec(
            num_scalar_prefetch=0,
            grid=grid,
            in_specs=[
                pl.BlockSpec((tm, K_pad), lambda i: (i, 0)),     # streamed patch rows
                pl.BlockSpec((K_pad, D), lambda i: (0, 0)),      # resident weight
                pl.BlockSpec((1, D), lambda i: (0, 0)),          # conv bias
                pl.BlockSpec((1, D), lambda i: (0, 0)),          # LN gamma
                pl.BlockSpec((1, D), lambda i: (0, 0)),          # LN beta
            ],
            out_specs=pl.BlockSpec((tm, D), lambda i: (i, 0)),
        ),
        compiler_params=pltpu.CompilerParams(
            dimension_semantics=("parallel",),
            vmem_limit_bytes=vmem_limit),
        cost_estimate=pl.CostEstimate(flops=flops,
                                      transcendentals=N_pad,
                                      bytes_accessed=bytes_accessed),
    )(patches, w_mat, b_row, g_row, beta_row)

    if N_pad != N:
        out = out[:N]
    return out.reshape(B, Ho * Wo, D), Ho, Wo


def _reference(x, conv_w, conv_b, ln_w, ln_b, *, stride, eps=1e-5):
    """Pure-JAX reference mirroring the PyTorch module (f32 accumulation)."""
    D, C, kh, kw = conv_w.shape
    pad_h, pad_w = kh // 2, kw // 2
    y = jax.lax.conv_general_dilated(
        x.astype(jnp.float32), conv_w.astype(jnp.float32),
        window_strides=(stride, stride),
        padding=((pad_h, pad_h), (pad_w, pad_w)),
        dimension_numbers=("NCHW", "OIHW", "NCHW"))
    y = y + conv_b.astype(jnp.float32).reshape(1, D, 1, 1)
    B, _, Ho, Wo = y.shape
    t = y.reshape(B, D, Ho * Wo).transpose(0, 2, 1)               # (B, N, D)
    mean = jnp.mean(t, axis=-1, keepdims=True)
    var = jnp.mean((t - mean) ** 2, axis=-1, keepdims=True)
    tn = (t - mean) * jax.lax.rsqrt(var + eps)
    return tn * ln_w.astype(jnp.float32) + ln_b.astype(jnp.float32), Ho, Wo


if __name__ == "__main__":
    # Small shapes consistent with the module: patch_size=7, stride=4,
    # in_chans=4, embed_dim=32, batch=2, spatial=16.
    B, C, H, W = 2, 4, 16, 16
    D, kh, kw, stride = 32, 7, 7, 4

    key = jax.random.PRNGKey(0)
    kx, kw_key = jax.random.split(key)
    x = jax.random.normal(kx, (B, C, H, W), dtype=jnp.float32)

    # Deterministic parameter init mirroring _init_weights:
    # Conv2d: normal(0, sqrt(2 / fan_out)), fan_out = kh*kw*embed_dim; bias = 0.
    fan_out = kh * kw * D
    conv_w = jax.random.normal(kw_key, (D, C, kh, kw), dtype=jnp.float32) \
        * math.sqrt(2.0 / fan_out)
    conv_b = jnp.zeros((D,), dtype=jnp.float32)
    # LayerNorm: weight = 1, bias = 0.
    ln_w = jnp.ones((D,), dtype=jnp.float32)
    ln_b = jnp.zeros((D,), dtype=jnp.float32)

    out, Ho, Wo = overlap_patch_embed(x, conv_w, conv_b, ln_w, ln_b, stride=stride)
    out = jax.block_until_ready(out)

    # Reference sees the same bf16 rounding of the streamed operands as the
    # kernel (accumulation is f32 on both sides); the remaining differences are
    # accumulation order and the bf16 output cast.
    x_q = x.astype(jnp.bfloat16).astype(jnp.float32)
    w_q = conv_w.astype(jnp.bfloat16).astype(jnp.float32)
    ref, Ho_r, Wo_r = _reference(x_q, w_q, conv_b, ln_w, ln_b, stride=stride)

    assert (Ho, Wo) == (Ho_r, Wo_r)
    assert out.shape == (B, Ho * Wo, D)
    assert out.dtype == jnp.bfloat16
    assert jnp.allclose(out.astype(jnp.float32), ref, atol=5e-2, rtol=5e-2)

    print("KERNEL_OK")
</pallas_src>

<mosaic_0001>
module attributes {stable_mosaic.version = 11 : i64} {
  func.func @_patch_embed_kernel(%arg0: i32, %arg1: memref<8x208xbf16, #tpu.memory_space<vmem>>, %arg2: memref<208x32xbf16, #tpu.memory_space<vmem>>, %arg3: memref<1x32xf32, #tpu.memory_space<vmem>>, %arg4: memref<1x32xf32, #tpu.memory_space<vmem>>, %arg5: memref<1x32xf32, #tpu.memory_space<vmem>>, %arg6: memref<8x32xbf16, #tpu.memory_space<vmem>>) attributes {dimension_semantics = [#tpu.dimension_semantics<parallel>], iteration_bounds = array<i64: 4>, scalar_prefetch = 0 : i64, scratch_operands = 0 : i64, tpu.core_type = #tpu.core_type<tc>, window_params = [{transform_indices = @transform_0, window_bounds = array<i64: 8, 208>}, {pipeline_mode = #tpu.pipeline_mode<synchronous>, transform_indices = @transform_1, window_bounds = array<i64: 208, 32>}, {pipeline_mode = #tpu.pipeline_mode<synchronous>, transform_indices = @transform_2, window_bounds = array<i64: 1, 32>}, {pipeline_mode = #tpu.pipeline_mode<synchronous>, transform_indices = @transform_3, window_bounds = array<i64: 1, 32>}, {pipeline_mode = #tpu.pipeline_mode<synchronous>, transform_indices = @transform_4, window_bounds = array<i64: 1, 32>}, {transform_indices = @transform_5, window_bounds = array<i64: 8, 32>}]} {
    %c0 = arith.constant 0 : index
    %c0_0 = arith.constant 0 : index
    %0 = vector.load %arg1[%c0, %c0_0] : memref<8x208xbf16, #tpu.memory_space<vmem>>, vector<8x208xbf16>
    %c0_1 = arith.constant 0 : index
    %c0_2 = arith.constant 0 : index
    %1 = vector.load %arg2[%c0_1, %c0_2] : memref<208x32xbf16, #tpu.memory_space<vmem>>, vector<208x32xbf16>
    %cst = arith.constant dense<0.000000e+00> : vector<8x32xf32>
    %2 = tpu.matmul %0, %1, %cst {dimension_numbers = #tpu.dot_dimension_numbers<[1], [0], [0], [1], [0, 0, 1, 1], [], []>} : vector<8x208xbf16>, vector<208x32xbf16>, vector<8x32xf32> -> vector<8x32xf32>
    %c0_3 = arith.constant 0 : index
    %c0_4 = arith.constant 0 : index
    %3 = vector.load %arg3[%c0_3, %c0_4] : memref<1x32xf32, #tpu.memory_space<vmem>>, vector<1x32xf32>
    %4 = vector.broadcast %3 : vector<1x32xf32> to vector<8x32xf32>
    %5 = arith.addf %2, %4 : vector<8x32xf32>
    %cst_5 = arith.constant dense<0.000000e+00> : vector<8xf32>
    %6 = vector.multi_reduction <add>, %5, %cst_5 [1] : vector<8x32xf32> to vector<8xf32>
    %7 = vector.shape_cast %6 : vector<8xf32> to vector<8x1xf32>
    %8 = arith.mulf %5, %5 : vector<8x32xf32>
    %cst_6 = arith.constant dense<0.000000e+00> : vector<8xf32>
    %9 = vector.multi_reduction <add>, %8, %cst_6 [1] : vector<8x32xf32> to vector<8xf32>
    %10 = vector.shape_cast %9 : vector<8xf32> to vector<8x1xf32>
    %cst_7 = arith.constant 3.125000e-02 : f32
    %11 = vector.broadcast %cst_7 : f32 to vector<8x1xf32>
    %12 = arith.mulf %7, %11 : vector<8x1xf32>
    %cst_8 = arith.constant 3.125000e-02 : f32
    %13 = vector.broadcast %cst_8 : f32 to vector<8x1xf32>
    %14 = arith.mulf %10, %13 : vector<8x1xf32>
    %15 = arith.mulf %12, %12 : vector<8x1xf32>
    %16 = arith.subf %14, %15 : vector<8x1xf32>
    %cst_9 = arith.constant 0.000000e+00 : f32
    %17 = vector.broadcast %cst_9 : f32 to vector<8x1xf32>
    %18 = arith.maximumf %16, %17 : vector<8x1xf32>
    %cst_10 = arith.constant 9.99999974E-6 : f32
    %19 = vector.broadcast %cst_10 : f32 to vector<8x1xf32>
    %20 = arith.addf %18, %19 : vector<8x1xf32>
    %21 = math.rsqrt %20 : vector<8x1xf32>
    %22 = vector.broadcast %12 : vector<8x1xf32> to vector<8x32xf32>
    %23 = arith.subf %5, %22 : vector<8x32xf32>
    %24 = vector.broadcast %21 : vector<8x1xf32> to vector<8x32xf32>
    %25 = arith.mulf %23, %24 : vector<8x32xf32>
    %c0_11 = arith.constant 0 : index
    %c0_12 = arith.constant 0 : index
    %26 = vector.load %arg4[%c0_11, %c0_12] : memref<1x32xf32, #tpu.memory_space<vmem>>, vector<1x32xf32>
    %27 = vector.broadcast %26 : vector<1x32xf32> to vector<8x32xf32>
    %28 = arith.mulf %25, %27 : vector<8x32xf32>
    %c0_13 = arith.constant 0 : index
    %c0_14 = arith.constant 0 : index
    %29 = vector.load %arg5[%c0_13, %c0_14] : memref<1x32xf32, #tpu.memory_space<vmem>>, vector<1x32xf32>
    %30 = vector.broadcast %29 : vector<1x32xf32> to vector<8x32xf32>
    %31 = arith.addf %28, %30 : vector<8x32xf32>
    %32 = arith.truncf %31 : vector<8x32xf32> to vector<8x32xbf16>
    %c0_15 = arith.constant 0 : index
    %c0_16 = arith.constant 0 : index
    %33 = vector.load %arg6[%c0_15, %c0_16] : memref<8x32xbf16, #tpu.memory_space<vmem>>, vector<8x32xbf16>
    tpu.vector_store %arg6[%c0_15, %c0_16], %32 {strides = array<i32>} : memref<8x32xbf16, #tpu.memory_space<vmem>>, vector<8x32xbf16>,
    return
  }
  func.func @transform_0(%arg0: i32) -> (i32, i32) {
    %c0_i32 = arith.constant 0 : i32
    %c0_i32_0 = arith.constant 0 : i32
    return %arg0, %c0_i32 : i32, i32
  }
  func.func @transform_1(%arg0: i32) -> (i32, i32) {
    %c0_i32 = arith.constant 0 : i32
    %c0_i32_0 = arith.constant 0 : i32
    %c0_i32_1 = arith.constant 0 : i32
    return %c0_i32, %c0_i32_0 : i32, i32
  }
  func.func @transform_2(%arg0: i32) -> (i32, i32) {
    %c0_i32 = arith.constant 0 : i32
    %c0_i32_0 = arith.constant 0 : i32
    %c0_i32_1 = arith.constant 0 : i32
    return %c0_i32, %c0_i32_0 : i32, i32
  }
  func.func @transform_3(%arg0: i32) -> (i32, i32) {
    %c0_i32 = arith.constant 0 : i32
    %c0_i32_0 = arith.constant 0 : i32
    %c0_i32_1 = arith.constant 0 : i32
    return %c0_i32, %c0_i32_0 : i32, i32
  }
  func.func @transform_4(%arg0: i32) -> (i32, i32) {
    %c0_i32 = arith.constant 0 : i32
    %c0_i32_0 = arith.constant 0 : i32
    %c0_i32_1 = arith.constant 0 : i32
    return %c0_i32, %c0_i32_0 : i32, i32
  }
  func.func @transform_5(%arg0: i32) -> (i32, i32) {
    %c0_i32 = arith.constant 0 : i32
    %c0_i32_0 = arith.constant 0 : i32
    return %arg0, %c0_i32 : i32, i32
  }
}

</mosaic_0001>

<bundles_post_ra>
// kernel: tpu_custom_call.1
= control target key start
LH: loop header
LB: loop body
LE: loop exit
PB: predicated region body
PF: predicated region fallthrough
CT: control target
= control target key end

     0   :  { %10 = vsyncpa [#allocation3], 0  ;;  %s832_s0 = inlined_call_operand.vmem [shape: bf16[32,208], index: 0, kind: input, shape index: {}]   ;;  %s833_s1 = inlined_call_operand.vmem [shape: bf16[208,32], index: 1, kind: input, shape index: {}]   ;;  %s834_s2 = inlined_call_operand.vmem [shape: f32[1,32], index: 2, kind: input, shape index: {}]   ;;  %s835_s3 = inlined_call_operand.vmem [shape: f32[1,32], index: 3, kind: input, shape index: {}]   ;;  %s836_s4 = inlined_call_operand.vmem [shape: f32[1,32], index: 4, kind: input, shape index: {}]   ;;  %s837_s5 = inlined_call_operand.hbm [shape: bf16[32,32], index: 5, kind: output, shape index: {}]  }
   0x1   :  { %12 = vsyncpa [#allocation3 + $0x1], 0  ;;  %s699_s18 = smov 0   ;;  %s701_s19 = smov 0  }
   0x2   :  { %s703_s20 = smov 0   ;;  %s705_s21 = smov 0  }
   0x3 LB: > { %s720_s22 = sadd.s32 4294967295, %s667_s21   ;;  %s483_s23 = sadd.s32 4294967294, %s667_s21   ;;  %s667_s21 = sphi %s705_s21, %s843_s21   ;;  %s663_s20 = sphi %s703_s20, %s842_s20   ;;  %s659_s19 = sphi %s701_s19, %s841_s19   ;;  %s655_s18 = sphi %s699_s18, %s840_s18  }
   0x4   : > { %s724_s24 = sadd.s32 1, %s667_s21   ;;  %s135_s25 = sadd.s32 1, %s663_s20 }
   0x5   : > { %s132_s26 = ssub.s32 %s667_s21, %s724_s24  ;;  %p145_p0 = scmp.ne.s32.totalorder %s663_s20, %s659_s19 }
   0x6   : > { %p133_p1 = scmp.eq.s32.totalorder %s132_s26, 0  ;;  %p146_p2 = scmp.eq.s32.totalorder %s720_s22, 3 }
   0x7   : > { %p151_p3 = scmp.ne.s32.totalorder %s659_s19, %s655_s18  ;;  %p152_p4 = scmp.eq.s32.totalorder %s483_s23, 3 }
   0x8   : > { %s735_s27 = scalar_select %p133_p1, %s663_s20, %s135_s25  }
   0x9   : > { %p737_p5 = por %p146_p2, %p145_p0  ;;  %p741_p6 = por %p152_p4, %p151_p3 }
   0xa   : > { %p486_p7 = scmp.ge.s32.totalorder %s667_s21, 1  ;;  %p190_p8 = scmp.lt.s32.totalorder %s667_s21, 5 }
   0xc   : > { %p191_p9 = pnand %p486_p7, %p190_p8 }
   0xd   : > { %p218_p10 = scmp.lt.s32.totalorder (!%p191_p9), %s720_s22, 3  ;;  %s215_s6 = sand.u32 (!%p191_p9), 1, %s659_s19  }
   0xe   : > { %194 = sbr.rel (%p191_p9) target bundleno = 343 (0x157), region = 40  ;;  %s487_s7 = sshll.u32 (!%p191_p9), %s215_s6, 2 }
   0xf   : > { %s544_s8 = sshll.u32 (!%p191_p9), %s720_s22, 2  ;;  %s217_s16 = scalar_lea.vmem (!%p191_p9), [#allocation2], %s487_s7 }
  0x10   : > { %s419_s15 = scalar_lea.hbm (!%p191_p9), %s837_s5, %s544_s8  ;;  %s409_s23 = scalar_lea.sflag (!%p191_p9), [#allocation3], %s215_s6 }
  0x11   : > { %s423_s17 = sshll.u32 (!%p191_p9), %s419_s15, 4  ;;  %s625_s7 = scalar_lea.hbm (!%p191_p9), %s837_s5, 16  ;;  %s424_s17 = int_to_ptr.hbm [resolvable:$true] %s423_s17 }
  0x12   : > { %s619_s25 = sshra.s32 (!%p191_p9), %s424_s17, 4  ;;  %s620_s25 = int_to_ptr.hbm [resolvable:$true] %s619_s25 }
  0x13   : > { %v555_v0 = vld [vmem:[%s833_s1 + $0x38] sm:$0xff]  ;;  %v560_v1 = vld [vmem:[%s833_s1 + $0x60] sm:$0xff]  ;;  %v554_v2 = vld [vmem:[%s833_s1 + $0x30] sm:$0xff]  ;;  %s219_s13 = scalar_select %p218_p10, %s720_s22, 3  ;;  %vm339_vm0 = vcmask 654336   ;;  %vm369_vm1 = vcmask 261120  }
  0x14   : > { %343 = vmatpush.bf16.msra.mxu0 %v555_v0  ;;  %359 = vmatpush.bf16.msra.mxu1 %v560_v1  ;;  %v559_v3 = vld [vmem:[%s833_s1 + $0x58] sm:$0xff]  ;;  %v553_v4 = vld [vmem:[%s833_s1 + $0x28] sm:$0xff]  ;;  %v558_v5 = vld [vmem:[%s833_s1 + $0x50] sm:$0xff]  ;;  %s421_s22 = sshll.u32 %s217_s16, 4  ;;  %vm406_vm5 = vcmask 257024   ;;  %s621_s26 = scalar_lea.hbm %s620_s25, 4  ;;  %s422_s22 = int_to_ptr.vmem [resolvable:$true] %s421_s22 }
  0x15   : > { %s547_s14 = sshll.u32 %s219_s13, 3  ;;  %v552_v6 = vld [vmem:[%s833_s1 + $0x20] sm:$0xff]  ;;  %v557_v7 = vld [vmem:[%s833_s1 + $0x48] sm:$0xff]  ;;  %v551_v10 = vld [vmem:[%s833_s1 + $0x18] sm:$0xff]  ;;  %p622_p11 = scmp.ne.s32.totalorder %s620_s25, %s621_s26 }
  0x16   : > { %s222_s30 = scalar_lea.vmem %s832_s0, %s547_s14  ;;  %v556_v11 = vld [vmem:[%s833_s1 + $0x40] sm:$0xff]  ;;  %v550_v13 = vld [vmem:[%s833_s1 + $0x10] sm:$0xff]  ;;  %v549_v14 = vld [vmem:[%s833_s1 + $0x8] sm:$0xff]  ;;  %p626_p0 = scmp.lt.s32.totalorder %s620_s25, %s837_s5 }
  0x17   : > { %v224_v8 = vld [vmem:[%s222_s30] sm:$0xff]  ;;  %p623_p12 = pnand %p622_p11, %p737_p5  ;;  %p627_p1 = scmp.lt.s32.totalorder %s625_s7, %s621_s26 }
  0x18   : > { %344 = vmatpush.bf16.msra.mxu0 %v554_v2  ;;  %360 = vmatpush.bf16.msra.mxu1 %v559_v3  ;;  %v257_v9 = vunpack.c.h.b16 %v224_v8  ;;  %v256_v15 = vunpack.c.l.b16 %v224_v8  ;;  %v548_v16 = vld [vmem:[%s833_s1] sm:$0xff] }
  0x19   : > { %v600_v20 = vld [vmem:[%s834_s2] ss:$0 sm:$0xff]  ;;  %p624_p13 = pneg %p623_p12  ;;  %p628_p2 = por %p627_p1, %p626_p0 }
  0x1a   : > { %v259_v12 = vpack.c.b16 %v257_v9, %v257_v9  ;;  %v258_v17 = vpack.c.b16 %v256_v15, %v256_v15  ;;  %v601_v43 = vld [vmem:[%s835_s3] ss:$0 sm:$0xff] }
  0x1b   : > { %v602_v46 = vld [vmem:[%s836_s4] ss:$0 sm:$0xff]  ;;  %p629_p3 = pnand %p628_p2, %p624_p13 }
  0x1c   : > { %345 = vmatpush.bf16.msra.mxu0 %v553_v4  ;;  %361 = vmatpush.bf16.msra.mxu1 %v558_v5 }
  0x20   : > { %346 = vmatpush.bf16.msra.mxu0 %v552_v6  ;;  %362 = vmatpush.bf16.msra.mxu1 %v557_v7 }
  0x24   : > { %347 = vmatpush.bf16.msra.mxu0 %v551_v10  ;;  %363 = vmatpush.bf16.msra.mxu1 %v556_v11 }
  0x27   : > { %542 = vmatmul.msk.bf16.vlgmr.msra.gmra.mxu1 %vm339_vm0, %v259_v12 }
  0x28   : > { %348 = vmatpush.bf16.msra.mxu0 %v550_v13 }
  0x2c   : > { %349 = vmatpush.bf16.msra.mxu0 %v549_v14 }
  0x30   : > { %350 = vmatpush.bf16.msra.mxu0 %v548_v16 }
  0x33   : > { %351 = vmatmul.bf16.vlgmr.msra.gmra.mxu0 %v258_v17 }
  0xa4   : > { %v365_v18 = vpop.f32.mrf.mxu1 }
  0xac   : > { %v367_v19 = vpop.f32.mrf.mxu1 }
  0xb0   : > { %v352_v21 = vpop.f32.mrf.mxu0 }
  0xb1   : > { %v353_v22 = vadd.f32 %v600_v20, %v352_v21 }
  0xb3   : > { %v366_v23 = vadd.f32 %v365_v18, %v353_v22 }
  0xb5   : > { %v370_v24 = vsel %vm369_vm1, %v366_v23, 0.0  ;;  %v373_v26 = vmul.f32 %v366_v23, %v366_v23 }
  0xb6   : > { %371 = vadd.xlane.f32.xlu0 %v370_v24 }
  0xb7   : > { %v374_v27 = vsel %vm369_vm1, %v373_v26, 0.0 }
  0xb8   : > { %v354_v25 = vpop.f32.mrf.mxu0 }
  0xbe   : > { %375 = vadd.xlane.f32.xlu0 %v374_v27 }
 0x129   : > { %v372_v28 = vpop.xlane.xlu0 %371 }
 0x12a   : > { %v377_v29 = vmul.f32 0.03125, %v372_v28 }
 0x12c   : > { %v379_v31 = vmul.f32 %v377_v29, %v377_v29  ;;  %v393_v42 = vsub.f32 %v366_v23, %v377_v29 }
 0x131   : > { %v376_v30 = vpop.xlane.xlu0 %375 }
 0x132   : > { %v378_v32 = vmul.f32 0.03125, %v376_v30 }
 0x134   : > { %v380_v33 = vsub.f32 %v378_v32, %v379_v31 }
 0x136   : > { %v381_v34 = vmax.f32 %v380_v33, 0.0 }
 0x138   : > { %v382_v35 = vadd.f32 1e-05, %v381_v34 }
 0x13a   : > { %603 = vrsqrt.f32 %v382_v35  ;;  %vm389_vm3 = vweird.f32 %v382_v35 }
 0x140   : > { %v604_v36 = vpop.eup %603 }
 0x141   : > { %v384_v37 = vmul.f32 %v604_v36, %v382_v35  ;;  %vm390_vm2 = vweird.f32 %v604_v36 }
 0x142   : > { %vm391_vm4 = vmor %vm389_vm3, %vm390_vm2 }
 0x143   : > { %v385_v38 = vmul.f32 %v604_v36, %v384_v37 }
 0x145   : > { %v386_v39 = vmul.f32 0.5, %v385_v38 }
 0x147   : > { %v387_v40 = vsub.f32 1.5, %v386_v39 }
 0x149   : > { %v388_v41 = vmul.f32 %v604_v36, %v387_v40 }
 0x14b   : > { %v392_v44 = vsel %vm391_vm4, %v604_v36, %v388_v41 }
 0x14c   : > { %v394_v45 = vmul.f32 %v393_v42, %v392_v44 }
 0x14e   : > { %v399_v47 = vmul.f32 %v601_v43, %v394_v45 }
 0x150   : > { %v404_v48 = vadd.f32 %v602_v46, %v399_v47 }
 0x152   : > { %v405_v49 = vpack.c.bf16 %v404_v48, %v404_v48 }
 0x154   : > { %407 = vst.msk [vmem:[%s217_s16] sm:$0xf] %vm406_vm5, %v405_v49 }
 0x155   : > { %632 = shalt.err (!%p629_p3)
}
 0x156   : > { %561 = dma.vmem_to_hbm [thread:$0]  (%p737_p5), %s422_s22, 64, %s424_s17, %s409_s23  }
 0x157 PF: > { %p567_p4 = scmp.ge.s32.totalorder %s667_s21, 2  ;;  %s435_s6 = sand.u32 1, %s655_s18  }
 0x158   : > { %s436_s11 = scalar_lea.sflag [#allocation3], %s435_s6 }
 0x159   : > { %p564_p7 = pnand %p567_p4, %p741_p6 }
 0x15b   : > { %p565_p8 = pneg %p564_p7 }
 0x15d   : > { %650 = dma.done.wait (%p565_p8), %s436_s11, 64  }
 0x15e   : > { %652 = vsyncadd (%p565_p8), %s436_s11, 4294967232  ;;  %p15_p9 = scmp.ge.s32.totalorder %s724_s24, 6   ;;  %s840_s18 = smov %s659_s19 }
 0x15f   : > { %s841_s19 = smov %s663_s20  ;;  %s842_s20 = smov %s735_s27 }
 0x160   : > { %s843_s21 = smov %s724_s24  ;;  %17 = sbr.rel (!%p15_p9) target bundleno = 3 (0x3), region = 75 }
 0x165   :  { %442 = vsyncpa [#allocation3], 1 }
 0x166   :  { %444 = vsyncpa [#allocation3 + $0x1], 1 }

</bundles_post_ra>
